<compile_context>
chip_gen: v6e
topology: v6e:2x2x1
jax: 0.10.0
libtpu: 0.0.40
codegen_flags: <defaults>
</compile_context>

<pallas_src>
import functools
import math

import jax
import jax.numpy as jnp
from jax.experimental import pallas as pl
from jax.experimental.pallas import tpu as pltpu


def _round_up(x: int, m: int) -> int:
    return ((x + m - 1) // m) * m


def _sqapci_lstm_kernel(q_ref, a_ref, l_ref, r_ref, h_ref, c_ref,
                        w_ref, b_ref, h_out_ref, c_out_ref, *,
                        hidden_size: int, q_size: int, a_size: int,
                        l_size: int, r_size: int):
    H = hidden_size
    f32 = jnp.float32

    o1 = q_size
    o2 = o1 + a_size
    o3 = o2 + l_size
    o4 = o3 + r_size
    o5 = o4 + H

    # Fused projection computed as five K-chunks of the fused weight so the
    # [block_b, K] operand never exists in HBM (total MXU K-rows pushed is the
    # same as a single K = Q+A+L+R+H dot).
    gates = (
        jnp.dot(q_ref[...], w_ref[0:o1, :], preferred_element_type=f32)
        + jnp.dot(a_ref[...], w_ref[o1:o2, :], preferred_element_type=f32)
        + jnp.dot(l_ref[...], w_ref[o2:o3, :], preferred_element_type=f32)
        + jnp.dot(r_ref[...], w_ref[o3:o4, :], preferred_element_type=f32)
        + jnp.dot(h_ref[...], w_ref[o4:o5, :], preferred_element_type=f32)
        + b_ref[...]
    )

    # ONE full-width EUP tanh over [block_b, 4H].  The i/f/o columns of the
    # fused weight & bias carry a 0.5 pre-scale (see prepare_sqapci_params), so
    # sigmoid(z) == 0.5*tanh(0.5 z)+0.5 == 0.5*t+0.5 on those lanes, while the
    # (unscaled) cell lanes give tanh(z) directly.  Slices only at the combine.
    t = jnp.tanh(gates)
    sig = 0.5 * t + 0.5
    i_act = sig[:, 0 * H:1 * H]
    f_act = sig[:, 1 * H:2 * H]
    g_act = t[:, 2 * H:3 * H]
    o_act = sig[:, 3 * H:4 * H]

    c_prev = c_ref[...].astype(f32)
    c_new = f_act * c_prev + i_act * g_act
    h_new = o_act * jnp.tanh(c_new)

    h_out_ref[...] = h_new.astype(h_out_ref.dtype)
    c_out_ref[...] = c_new.astype(c_out_ref.dtype)   # always f32


def prepare_sqapci_params(params, hidden_size: int, *, is_peephole: bool = False,
                          compute_dtype=None):
    """Fuse the 10 module parameters ONCE (hoisted out of the per-step path).

    Folds (a) the peephole masking and (b) the 0.5 sigmoid pre-scale on the
    input/forget/output gate columns into the fused weight & bias.
    """
    wq, wa, wl, wr, wh, bq, ba, bl, br, bh = [
        jnp.asarray(p, jnp.float32) for p in params]
    H = hidden_size
    if is_peephole:
        # Equivalent to zeroing q/a/l_temp[:, 2H:3H] after the bias add.
        wq = wq.at[:, 2 * H:3 * H].set(0.0); bq = bq.at[2 * H:3 * H].set(0.0)
        wa = wa.at[:, 2 * H:3 * H].set(0.0); ba = ba.at[2 * H:3 * H].set(0.0)
        wl = wl.at[:, 2 * H:3 * H].set(0.0); bl = bl.at[2 * H:3 * H].set(0.0)
    w = jnp.concatenate([wq, wa, wl, wr, wh], axis=0)            # [K, 4H]
    b = (bq + ba + bl + br + bh).reshape(1, 4 * H)               # [1, 4H]
    # 0.5 pre-scale on i/f/o columns; cell columns (2H:3H) untouched.
    scale = jnp.concatenate(
        [jnp.full((1, 2 * H), 0.5, jnp.float32),
         jnp.ones((1, H), jnp.float32),
         jnp.full((1, H), 0.5, jnp.float32)], axis=1)
    w = w * scale
    b = b * scale
    if compute_dtype is not None:
        w = w.astype(compute_dtype)
    return w, b                                                   # b stays f32


def sqapci_lstm_cell(question, answer, left, right, init_states, fused_params,
                     *, compute_dtype=None, block_b_max: int = 1024,
                     interpret: bool = False):
    """Pallas forward of SQAPCILSTMCell.  Returns (h, c); c is always f32."""
    h_prev, c_prev = init_states
    w_fused, b_fused = fused_params

    B = question.shape[0]
    Q, A = question.shape[1], answer.shape[1]
    L, R = left.shape[1], right.shape[1]
    H = h_prev.shape[1]
    K = Q + A + L + R + H
    assert w_fused.shape == (K, 4 * H), (w_fused.shape, (K, 4 * H))
    out_dtype = question.dtype

    xs = [question, answer, left, right, h_prev]
    if compute_dtype is not None:
        # NOTE: ideally upstream already stores activations in compute_dtype;
        # this cast is a convenience for mixed callers.
        xs = [x.astype(compute_dtype) for x in xs]
    x_dtype = xs[0].dtype
    align = 16 if jnp.dtype(x_dtype).itemsize == 2 else 8   # bf16 packs 16 sublanes

    b_pad = _round_up(B, align)
    if b_pad <= 512:
        # Latency-bound small-batch case: single fat block, grid=(1,).
        block_b = b_pad
    else:
        # Large batch: big tiles, but force >= 2 grid steps so the "parallel"
        # axis can shard across both TensorCores on v7x.
        block_b = min(block_b_max, _round_up(-(-b_pad // 2), align))
        b_pad = _round_up(b_pad, block_b)

    if b_pad != B:
        pad = b_pad - B
        xs = [jnp.pad(x, ((0, pad), (0, 0))) for x in xs]
        c_in = jnp.pad(c_prev, ((0, pad), (0, 0)))
    else:
        c_in = c_prev

    grid = (b_pad // block_b,)

    kernel = functools.partial(
        _sqapci_lstm_kernel, hidden_size=H,
        q_size=Q, a_size=A, l_size=L, r_size=R)

    def batch_spec(d):
        return pl.BlockSpec((block_b, d), lambda i: (i, 0))

    h_out, c_out = pl.pallas_call(
        kernel,
        out_shape=(jax.ShapeDtypeStruct((b_pad, H), out_dtype),
                   jax.ShapeDtypeStruct((b_pad, H), jnp.float32)),
        grid=grid,
        in_specs=[
            batch_spec(Q),                                   # question
            batch_spec(A),                                   # answer
            batch_spec(L),                                   # left
            batch_spec(R),                                   # right
            batch_spec(H),                                   # h_{t-1}
            batch_spec(H),                                   # c_{t-1}
            pl.BlockSpec((K, 4 * H), lambda i: (0, 0)),      # fused weight (resident)
            pl.BlockSpec((1, 4 * H), lambda i: (0, 0)),      # fused bias
        ],
        out_specs=(pl.BlockSpec((block_b, H), lambda i: (i, 0)),
                   pl.BlockSpec((block_b, H), lambda i: (i, 0))),
        compiler_params=pltpu.CompilerParams(
            dimension_semantics=("parallel",)),
        interpret=interpret,
    )(*xs, c_in, w_fused, b_fused)

    if b_pad != B:
        h_out = h_out[:B]
        c_out = c_out[:B]
    return h_out, c_out


def _reference(question, answer, left, right, init_states, params,
               *, is_peephole: bool = False):
    h_prev, c_prev = init_states
    (wq, wa, wl, wr, wh, bq, ba, bl, br, bh) = params
    H = h_prev.shape[1]
    q_temp = question @ wq + bq
    a_temp = answer @ wa + ba
    l_temp = left @ wl + bl
    r_temp = right @ wr + br
    if is_peephole:
        q_temp = q_temp.at[:, 2 * H:3 * H].set(0.0)
        a_temp = a_temp.at[:, 2 * H:3 * H].set(0.0)
        l_temp = l_temp.at[:, 2 * H:3 * H].set(0.0)
    gates = q_temp + a_temp + l_temp + r_temp + h_prev @ wh + bh
    ig, fg, cc, og = jnp.split(gates, 4, axis=1)
    c = jax.nn.sigmoid(fg) * c_prev + jax.nn.sigmoid(ig) * jnp.tanh(cc)
    h = jax.nn.sigmoid(og) * jnp.tanh(c)
    return h, c


if __name__ == "__main__":
    # Small shapes consistent with the module (K = 32+32+16+16+32 = 128).
    B = 8
    Q_SIZE, A_SIZE, L_SIZE, R_SIZE = 32, 32, 16, 16
    H = 32
    stdv = 1.0 / math.sqrt(H)

    key = jax.random.PRNGKey(0)
    keys = jax.random.split(key, 16)

    def uni(k, shape):
        return jax.random.uniform(k, shape, jnp.float32, minval=-stdv, maxval=stdv)

    # Deterministic parameter init (same distribution as the module's init).
    wq = uni(keys[0], (Q_SIZE, 4 * H))
    wa = uni(keys[1], (A_SIZE, 4 * H))
    wl = uni(keys[2], (L_SIZE, 4 * H))
    wr = uni(keys[3], (R_SIZE, 4 * H))
    wh = uni(keys[4], (H, 4 * H))
    bq = uni(keys[5], (4 * H,))
    ba = uni(keys[6], (4 * H,))
    bl = uni(keys[7], (4 * H,))
    br = uni(keys[8], (4 * H,))
    bh = uni(keys[9], (4 * H,))
    params = (wq, wa, wl, wr, wh, bq, ba, bl, br, bh)

    question = jax.random.normal(keys[10], (B, Q_SIZE), jnp.float32)
    answer   = jax.random.normal(keys[11], (B, A_SIZE), jnp.float32)
    left     = jax.random.normal(keys[12], (B, L_SIZE), jnp.float32)
    right    = jax.random.normal(keys[13], (B, R_SIZE), jnp.float32)
    h0       = jax.random.normal(keys[14], (B, H), jnp.float32)
    c0       = jax.random.normal(keys[15], (B, H), jnp.float32)

    # --- f32 path (no peephole); params fused ONCE outside the step path. ---
    fused_f32 = prepare_sqapci_params(params, H, is_peephole=False)
    h, c = sqapci_lstm_cell(question, answer, left, right, (h0, c0), fused_f32)
    jax.block_until_ready((h, c))
    h_ref, c_ref = _reference(question, answer, left, right, (h0, c0), params,
                              is_peephole=False)
    assert h.dtype == question.dtype and c.dtype == jnp.float32
    assert jnp.allclose(h, h_ref, atol=1e-4, rtol=1e-4)
    assert jnp.allclose(c, c_ref, atol=1e-4, rtol=1e-4)

    # --- f32 path, peephole variant (mask folded into the fused params). ---
    fused_peep = prepare_sqapci_params(params, H, is_peephole=True)
    h_p, c_p = sqapci_lstm_cell(question, answer, left, right, (h0, c0), fused_peep)
    jax.block_until_ready((h_p, c_p))
    h_pr, c_pr = _reference(question, answer, left, right, (h0, c0), params,
                            is_peephole=True)
    assert jnp.allclose(h_p, h_pr, atol=1e-4, rtol=1e-4)
    assert jnp.allclose(c_p, c_pr, atol=1e-4, rtol=1e-4)

    # --- bf16 matmul operands (f32 accumulation / f32 gate math, f32 c out).
    # Also exercises the bf16 16-sublane padding path (B=8 -> block of 16). ---
    fused_bf16 = prepare_sqapci_params(params, H, is_peephole=False,
                                       compute_dtype=jnp.bfloat16)
    h_bf, c_bf = sqapci_lstm_cell(question, answer, left, right, (h0, c0),
                                  fused_bf16, compute_dtype=jnp.bfloat16)
    jax.block_until_ready((h_bf, c_bf))
    assert c_bf.dtype == jnp.float32
    assert jnp.allclose(h_bf, h_ref, atol=5e-2, rtol=5e-2)
    assert jnp.allclose(c_bf, c_ref, atol=5e-2, rtol=5e-2)

    print("KERNEL_OK")
</pallas_src>

<mosaic_0001>
module attributes {stable_mosaic.version = 11 : i64} {
  func.func @_sqapci_lstm_kernel(%arg0: i32, %arg1: memref<8x32xf32, #tpu.memory_space<vmem>>, %arg2: memref<8x32xf32, #tpu.memory_space<vmem>>, %arg3: memref<8x16xf32, #tpu.memory_space<vmem>>, %arg4: memref<8x16xf32, #tpu.memory_space<vmem>>, %arg5: memref<8x32xf32, #tpu.memory_space<vmem>>, %arg6: memref<8x32xf32, #tpu.memory_space<vmem>>, %arg7: memref<128x128xf32, #tpu.memory_space<vmem>>, %arg8: memref<1x128xf32, #tpu.memory_space<vmem>>, %arg9: memref<8x32xf32, #tpu.memory_space<vmem>>, %arg10: memref<8x32xf32, #tpu.memory_space<vmem>>) attributes {dimension_semantics = [#tpu.dimension_semantics<parallel>], iteration_bounds = array<i64: 1>, scalar_prefetch = 0 : i64, scratch_operands = 0 : i64, tpu.core_type = #tpu.core_type<tc>, window_params = [{transform_indices = @transform_0, window_bounds = array<i64: 8, 32>}, {transform_indices = @transform_1, window_bounds = array<i64: 8, 32>}, {transform_indices = @transform_2, window_bounds = array<i64: 8, 16>}, {transform_indices = @transform_3, window_bounds = array<i64: 8, 16>}, {transform_indices = @transform_4, window_bounds = array<i64: 8, 32>}, {transform_indices = @transform_5, window_bounds = array<i64: 8, 32>}, {pipeline_mode = #tpu.pipeline_mode<synchronous>, transform_indices = @transform_6, window_bounds = array<i64: 128, 128>}, {pipeline_mode = #tpu.pipeline_mode<synchronous>, transform_indices = @transform_7, window_bounds = array<i64: 1, 128>}, {transform_indices = @transform_8, window_bounds = array<i64: 8, 32>}, {transform_indices = @transform_9, window_bounds = array<i64: 8, 32>}]} {
    %c0 = arith.constant 0 : index
    %c0_0 = arith.constant 0 : index
    %0 = vector.load %arg1[%c0, %c0_0] : memref<8x32xf32, #tpu.memory_space<vmem>>, vector<8x32xf32>
    %c0_1 = arith.constant 0 : index
    %c0_2 = arith.constant 0 : index
    %1 = vector.load %arg7[%c0_1, %c0_2] : memref<128x128xf32, #tpu.memory_space<vmem>>, vector<32x128xf32>
    %cst = arith.constant dense<0.000000e+00> : vector<8x128xf32>
    %2 = tpu.matmul %0, %1, %cst {dimension_numbers = #tpu.dot_dimension_numbers<[1], [0], [0], [1], [0, 0, 1, 1], [], []>} : vector<8x32xf32>, vector<32x128xf32>, vector<8x128xf32> -> vector<8x128xf32>
    %c0_3 = arith.constant 0 : index
    %c0_4 = arith.constant 0 : index
    %3 = vector.load %arg2[%c0_3, %c0_4] : memref<8x32xf32, #tpu.memory_space<vmem>>, vector<8x32xf32>
    %c32 = arith.constant 32 : index
    %c0_5 = arith.constant 0 : index
    %4 = vector.load %arg7[%c32, %c0_5] : memref<128x128xf32, #tpu.memory_space<vmem>>, vector<32x128xf32>
    %cst_6 = arith.constant dense<0.000000e+00> : vector<8x128xf32>
    %5 = tpu.matmul %3, %4, %cst_6 {dimension_numbers = #tpu.dot_dimension_numbers<[1], [0], [0], [1], [0, 0, 1, 1], [], []>} : vector<8x32xf32>, vector<32x128xf32>, vector<8x128xf32> -> vector<8x128xf32>
    %6 = arith.addf %2, %5 : vector<8x128xf32>
    %c0_7 = arith.constant 0 : index
    %c0_8 = arith.constant 0 : index
    %7 = vector.load %arg3[%c0_7, %c0_8] : memref<8x16xf32, #tpu.memory_space<vmem>>, vector<8x16xf32>
    %c64 = arith.constant 64 : index
    %c0_9 = arith.constant 0 : index
    %8 = vector.load %arg7[%c64, %c0_9] : memref<128x128xf32, #tpu.memory_space<vmem>>, vector<16x128xf32>
    %cst_10 = arith.constant dense<0.000000e+00> : vector<8x128xf32>
    %9 = tpu.matmul %7, %8, %cst_10 {dimension_numbers = #tpu.dot_dimension_numbers<[1], [0], [0], [1], [0, 0, 1, 1], [], []>} : vector<8x16xf32>, vector<16x128xf32>, vector<8x128xf32> -> vector<8x128xf32>
    %10 = arith.addf %6, %9 : vector<8x128xf32>
    %c0_11 = arith.constant 0 : index
    %c0_12 = arith.constant 0 : index
    %11 = vector.load %arg4[%c0_11, %c0_12] : memref<8x16xf32, #tpu.memory_space<vmem>>, vector<8x16xf32>
    %c80 = arith.constant 80 : index
    %c0_13 = arith.constant 0 : index
    %12 = vector.load %arg7[%c80, %c0_13] : memref<128x128xf32, #tpu.memory_space<vmem>>, vector<16x128xf32>
    %cst_14 = arith.constant dense<0.000000e+00> : vector<8x128xf32>
    %13 = tpu.matmul %11, %12, %cst_14 {dimension_numbers = #tpu.dot_dimension_numbers<[1], [0], [0], [1], [0, 0, 1, 1], [], []>} : vector<8x16xf32>, vector<16x128xf32>, vector<8x128xf32> -> vector<8x128xf32>
    %14 = arith.addf %10, %13 : vector<8x128xf32>
    %c0_15 = arith.constant 0 : index
    %c0_16 = arith.constant 0 : index
    %15 = vector.load %arg5[%c0_15, %c0_16] : memref<8x32xf32, #tpu.memory_space<vmem>>, vector<8x32xf32>
    %c96 = arith.constant 96 : index
    %c0_17 = arith.constant 0 : index
    %16 = vector.load %arg7[%c96, %c0_17] : memref<128x128xf32, #tpu.memory_space<vmem>>, vector<32x128xf32>
    %cst_18 = arith.constant dense<0.000000e+00> : vector<8x128xf32>
    %17 = tpu.matmul %15, %16, %cst_18 {dimension_numbers = #tpu.dot_dimension_numbers<[1], [0], [0], [1], [0, 0, 1, 1], [], []>} : vector<8x32xf32>, vector<32x128xf32>, vector<8x128xf32> -> vector<8x128xf32>
    %18 = arith.addf %14, %17 : vector<8x128xf32>
    %c0_19 = arith.constant 0 : index
    %c0_20 = arith.constant 0 : index
    %19 = vector.load %arg8[%c0_19, %c0_20] : memref<1x128xf32, #tpu.memory_space<vmem>>, vector<1x128xf32>
    %20 = vector.broadcast %19 : vector<1x128xf32> to vector<8x128xf32>
    %21 = arith.addf %18, %20 : vector<8x128xf32>
    %22 = math.tanh %21 : vector<8x128xf32>
    %cst_21 = arith.constant 5.000000e-01 : f32
    %23 = vector.broadcast %cst_21 : f32 to vector<8x128xf32>
    %24 = arith.mulf %23, %22 : vector<8x128xf32>
    %cst_22 = arith.constant 5.000000e-01 : f32
    %25 = vector.broadcast %cst_22 : f32 to vector<8x128xf32>
    %26 = arith.addf %24, %25 : vector<8x128xf32>
    %27 = vector.extract_strided_slice %26 {offsets = [0, 0], sizes = [8, 32], strides = [1, 1]} : vector<8x128xf32> to vector<8x32xf32>
    %28 = vector.extract_strided_slice %26 {offsets = [0, 32], sizes = [8, 32], strides = [1, 1]} : vector<8x128xf32> to vector<8x32xf32>
    %29 = vector.extract_strided_slice %22 {offsets = [0, 64], sizes = [8, 32], strides = [1, 1]} : vector<8x128xf32> to vector<8x32xf32>
    %30 = vector.extract_strided_slice %26 {offsets = [0, 96], sizes = [8, 32], strides = [1, 1]} : vector<8x128xf32> to vector<8x32xf32>
    %c0_23 = arith.constant 0 : index
    %c0_24 = arith.constant 0 : index
    %31 = vector.load %arg6[%c0_23, %c0_24] : memref<8x32xf32, #tpu.memory_space<vmem>>, vector<8x32xf32>
    %32 = arith.mulf %28, %31 : vector<8x32xf32>
    %33 = arith.mulf %27, %29 : vector<8x32xf32>
    %34 = arith.addf %32, %33 : vector<8x32xf32>
    %35 = math.tanh %34 : vector<8x32xf32>
    %36 = arith.mulf %30, %35 : vector<8x32xf32>
    %c0_25 = arith.constant 0 : index
    %c0_26 = arith.constant 0 : index
    %37 = vector.load %arg9[%c0_25, %c0_26] : memref<8x32xf32, #tpu.memory_space<vmem>>, vector<8x32xf32>
    tpu.vector_store %arg9[%c0_25, %c0_26], %36 {strides = array<i32>} : memref<8x32xf32, #tpu.memory_space<vmem>>, vector<8x32xf32>,
    %c0_27 = arith.constant 0 : index
    %c0_28 = arith.constant 0 : index
    %38 = vector.load %arg10[%c0_27, %c0_28] : memref<8x32xf32, #tpu.memory_space<vmem>>, vector<8x32xf32>
    tpu.vector_store %arg10[%c0_27, %c0_28], %34 {strides = array<i32>} : memref<8x32xf32, #tpu.memory_space<vmem>>, vector<8x32xf32>,
    return
  }
  func.func @transform_0(%arg0: i32) -> (i32, i32) {
    %c0_i32 = arith.constant 0 : i32
    %c0_i32_0 = arith.constant 0 : i32
    return %arg0, %c0_i32 : i32, i32
  }
  func.func @transform_1(%arg0: i32) -> (i32, i32) {
    %c0_i32 = arith.constant 0 : i32
    %c0_i32_0 = arith.constant 0 : i32
    return %arg0, %c0_i32 : i32, i32
  }
  func.func @transform_2(%arg0: i32) -> (i32, i32) {
    %c0_i32 = arith.constant 0 : i32
    %c0_i32_0 = arith.constant 0 : i32
    return %arg0, %c0_i32 : i32, i32
  }
  func.func @transform_3(%arg0: i32) -> (i32, i32) {
    %c0_i32 = arith.constant 0 : i32
    %c0_i32_0 = arith.constant 0 : i32
    return %arg0, %c0_i32 : i32, i32
  }
  func.func @transform_4(%arg0: i32) -> (i32, i32) {
    %c0_i32 = arith.constant 0 : i32
    %c0_i32_0 = arith.constant 0 : i32
    return %arg0, %c0_i32 : i32, i32
  }
  func.func @transform_5(%arg0: i32) -> (i32, i32) {
    %c0_i32 = arith.constant 0 : i32
    %c0_i32_0 = arith.constant 0 : i32
    return %arg0, %c0_i32 : i32, i32
  }
  func.func @transform_6(%arg0: i32) -> (i32, i32) {
    %c0_i32 = arith.constant 0 : i32
    %c0_i32_0 = arith.constant 0 : i32
    %c0_i32_1 = arith.constant 0 : i32
    return %c0_i32, %c0_i32_0 : i32, i32
  }
  func.func @transform_7(%arg0: i32) -> (i32, i32) {
    %c0_i32 = arith.constant 0 : i32
    %c0_i32_0 = arith.constant 0 : i32
    %c0_i32_1 = arith.constant 0 : i32
    return %c0_i32, %c0_i32_0 : i32, i32
  }
  func.func @transform_8(%arg0: i32) -> (i32, i32) {
    %c0_i32 = arith.constant 0 : i32
    %c0_i32_0 = arith.constant 0 : i32
    return %arg0, %c0_i32 : i32, i32
  }
  func.func @transform_9(%arg0: i32) -> (i32, i32) {
    %c0_i32 = arith.constant 0 : i32
    %c0_i32_0 = arith.constant 0 : i32
    return %arg0, %c0_i32 : i32, i32
  }
}

</mosaic_0001>

<bundles_post_ra>
// kernel: tpu_custom_call.1
= control target key start
LH: loop header
LB: loop body
LE: loop exit
PB: predicated region body
PF: predicated region fallthrough
CT: control target
= control target key end

     0   :  { %15 = vsyncpa [#allocation3], 0  ;;  %s964_s0 = inlined_call_operand.hbm [shape: f32[8,32], index: 0, kind: input, shape index: {}]   ;;  %s965_s1 = inlined_call_operand.hbm [shape: f32[8,32], index: 1, kind: input, shape index: {}]   ;;  %s966_s2 = inlined_call_operand.hbm [shape: f32[8,16], index: 2, kind: input, shape index: {}]   ;;  %s967_s3 = inlined_call_operand.hbm [shape: f32[8,16], index: 3, kind: input, shape index: {}]   ;;  %s968_s4 = inlined_call_operand.hbm [shape: f32[8,32], index: 4, kind: input, shape index: {}]   ;;  %s969_s5 = inlined_call_operand.vmem [shape: f32[8,32], index: 5, kind: input, shape index: {}]   ;;  %s970_s6 = inlined_call_operand.hbm [shape: f32[128,128], index: 6, kind: input, shape index: {}]   ;;  %s971_s7 = inlined_call_operand.vmem [shape: f32[1,128], index: 7, kind: input, shape index: {}]   ;;  %s972_s8 = inlined_call_operand.hbm [shape: f32[8,32], index: 8, kind: output, shape index: {0}]   ;;  %s973_s9 = inlined_call_operand.hbm [shape: f32[8,32], index: 9, kind: output, shape index: {1}]  }
   0x1   :  { %16 = vsyncpa [#allocation6], 0 }
   0x2   :  { %17 = vsyncpa [#allocation9], 0 }
   0x3   :  { %18 = vsyncpa [#allocation12], 0 }
   0x4   :  { %19 = vsyncpa [#allocation4], 0 }
   0x5   :  { %20 = vsyncpa [#allocation15], 0  ;;  %s836_s30 = smov [#allocation5]   ;;  %s837_s11 = smov [#allocation8]  }
   0x6   :  { %s37_s10 = sshll.u32 %s836_s30, 4  ;;  %s57_s12 = sshll.u32 %s837_s11, 4  ;;  %s38_s10 = int_to_ptr.vmem [resolvable:$true] %s37_s10  ;;  %s58_s12 = int_to_ptr.vmem [resolvable:$true] %s57_s12 }
   0x7   :  { %s672_s13 = scalar_lea.vmem %s38_s10, 128  ;;  %p677_p1 = scmp.lt.s32.totalorder %s38_s10, %s38_s10 }
   0x8   :  { %p673_p0 = scmp.ne.s32.totalorder %s38_s10, %s672_s13  ;;  %p678_p2 = scmp.lt.s32.totalorder %s672_s13, %s672_s13 }
   0xa   :  { %p679_p3 = por %p678_p2, %p677_p1 }
   0xc   :  { %p680_p4 = pnand %p679_p3, %p673_p0 }
   0xe   :  { %683 = shalt.err (!%p680_p4)
}
   0xf   :  { %40 = dma.hbm_to_vmem [thread:$0]  %s965_s1, 128, %s38_s10, [#allocation6]  }
  0x10   :  { %s692_s16 = scalar_lea.vmem %s58_s12, 128  ;;  %p697_p6 = scmp.lt.s32.totalorder %s58_s12, %s58_s12 }
  0x11   :  { %p693_p5 = scmp.ne.s32.totalorder %s58_s12, %s692_s16  ;;  %p698_p7 = scmp.lt.s32.totalorder %s692_s16, %s692_s16 }
  0x13   :  { %p699_p8 = por %p698_p7, %p697_p6 }
  0x15   :  { %p700_p9 = pnand %p699_p8, %p693_p5 }
  0x17   :  { %703 = shalt.err (!%p700_p9)
}
  0x18   :  { %60 = dma.hbm_to_vmem [thread:$0]  %s967_s3, 128, %s58_s12, [#allocation9]  }
  0x19   :  { %s838_s19 = smov [#allocation2]   ;;  %s839_s21 = smov [#allocation7]  }
  0x1a   :  { %s27_s20 = sshll.u32 %s838_s19, 4  ;;  %s47_s22 = sshll.u32 %s839_s21, 4  ;;  %s28_s20 = int_to_ptr.vmem [resolvable:$true] %s27_s20  ;;  %s48_s22 = int_to_ptr.vmem [resolvable:$true] %s47_s22 }
  0x1b   :  { %s712_s23 = scalar_lea.vmem %s28_s20, 128  ;;  %p717_p11 = scmp.lt.s32.totalorder %s28_s20, %s28_s20 }
  0x1c   :  { %p713_p10 = scmp.ne.s32.totalorder %s28_s20, %s712_s23  ;;  %p718_p12 = scmp.lt.s32.totalorder %s712_s23, %s712_s23 }
  0x1e   :  { %p719_p13 = por %p718_p12, %p717_p11 }
  0x20   :  { %p720_p0 = pnand %p719_p13, %p713_p10 }
  0x22   :  { %723 = shalt.err (!%p720_p0)
}
  0x23   :  { %30 = dma.hbm_to_vmem [thread:$0]  %s964_s0, 128, %s28_s20, [#allocation3]  }
  0x24   :  { %s732_s25 = scalar_lea.vmem %s48_s22, 128  ;;  %p737_p2 = scmp.lt.s32.totalorder %s48_s22, %s48_s22 }
  0x25   :  { %p733_p1 = scmp.ne.s32.totalorder %s48_s22, %s732_s25  ;;  %p738_p3 = scmp.lt.s32.totalorder %s732_s25, %s732_s25 }
  0x27   :  { %p739_p4 = por %p738_p3, %p737_p2 }
  0x29   :  { %p740_p5 = pnand %p739_p4, %p733_p1 }
  0x2b   :  { %743 = shalt.err (!%p740_p5)
}
  0x2c   :  { %50 = dma.hbm_to_vmem [thread:$0]  %s966_s2, 128, %s48_s22, [#allocation6]  }
  0x2d   :  { %s840_s27 = smov [#allocation10]   ;;  %s841_s29 = smov [#allocation11]  }
  0x2e   :  { %s67_s28 = sshll.u32 %s840_s27, 4  ;;  %s78_s30 = sshll.u32 %s841_s29, 4  ;;  %s68_s28 = int_to_ptr.vmem [resolvable:$true] %s67_s28  ;;  %s79_s30 = int_to_ptr.vmem [resolvable:$true] %s78_s30 }
  0x2f   :  { %s752_s10 = scalar_lea.vmem %s68_s28, 128  ;;  %p757_p7 = scmp.lt.s32.totalorder %s68_s28, %s68_s28 }
  0x30   :  { %p753_p6 = scmp.ne.s32.totalorder %s68_s28, %s752_s10  ;;  %p758_p8 = scmp.lt.s32.totalorder %s752_s10, %s752_s10 }
  0x32   :  { %p759_p9 = por %p758_p8, %p757_p7 }
  0x34   :  { %p760_p10 = pnand %p759_p9, %p753_p6 }
  0x36   :  { %763 = shalt.err (!%p760_p10)
}
  0x37   :  { %70 = dma.hbm_to_vmem [thread:$0]  %s968_s4, 128, %s68_s28, [#allocation9]  }
  0x38   :  { %s772_s12 = scalar_lea.vmem %s79_s30, 2048  ;;  %p777_p12 = scmp.lt.s32.totalorder %s79_s30, %s79_s30 }
  0x39   :  { %p773_p11 = scmp.ne.s32.totalorder %s79_s30, %s772_s12  ;;  %p778_p13 = scmp.lt.s32.totalorder %s772_s12, %s772_s12 }
  0x3b   :  { %p779_p0 = por %p778_p13, %p777_p12 }
  0x3d   :  { %p780_p1 = pnand %p779_p0, %p773_p11 }
  0x3f   :  { %783 = shalt.err (!%p780_p1)
}
  0x40   :  { %s842_s2 = smov 128   ;;  %s843_s13 = smov 8  }
  0x41   :  { %84 = dma.hbm_to_vmem [thread:$0]  %s970_s6, 2048, %s79_s30, [#allocation12], %s842_s2, %s842_s2, %s843_s13  }
  0x42   :  { %824 = dma.done.wait [#allocation3], 128  }
  0x43   :  { %825 = vsyncadd [#allocation3], 4294967168 }
  0x44   :  { %826 = dma.done.wait [#allocation6], 256  }
  0x45   :  { %827 = vsyncadd [#allocation6], 4294967040 }
  0x46   :  { %828 = dma.done.wait [#allocation9], 256  }
  0x47   :  { %829 = vsyncadd [#allocation9], 4294967040 }
  0x48   :  { %830 = dma.done.wait [#allocation12], 2048  }
  0x49   :  { %831 = vsyncadd [#allocation12], 4294965248  ;;  %v844_v0 = vmov 0.0   ;;  %vm845_vm0 = vmmov 0   ;;  %v109_v1 = vld [vmem:[#allocation11 + $0x18] sm:$0xff]  ;;  %v108_v3 = vld [vmem:[#allocation11 + $0x10] sm:$0xff] }
  0x4a   :  { %609 = vmatprep.subr.mxu1 %v844_v0  ;;  %598 = vmatprep.subr.mxu0 %v844_v0  ;;  %v114_v2 = vld [vmem:[#allocation11 + $0x38] sm:$0xff]  ;;  %v113_v4 = vld [vmem:[#allocation11 + $0x30] sm:$0xff]  ;;  %v107_v5 = vld [vmem:[#allocation11 + $0x8] sm:$0xff]  ;;  %vm115_vm1 = vcmask 261120   ;;  %vm265_vm2 = vcmask 130048   ;;  %s846_s16 = smov 64  }
  0x4b   :  { %617 = vmatprep.mubr.msk.f32.mxu1 %vm845_vm0, %v844_v0  ;;  %606 = vmatprep.mubr.msk.f32.mxu0 %vm845_vm0, %v844_v0  ;;  %v112_v6 = vld [vmem:[#allocation11 + $0x28] sm:$0xff]  ;;  %v106_v7 = vld [vmem:[#allocation11] sm:$0xff]  ;;  %v105_v9 = vld [vmem:[#allocation2] sm:$0xff]  ;;  %s847_s19 = smov 32   ;;  %s849_s20 = smov [#allocation14]  }
  0x4c   :  { %610 = vmatpush3.msra.mxu1 %v109_v1  ;;  %599 = vmatpush3.msra.mxu0 %v114_v2  ;;  %v111_v8 = vld [vmem:[#allocation11 + $0x20] sm:$0xff]  ;;  %v264_v11 = vld [vmem:[#allocation11 + $0x48] sm:$0xff]  ;;  %v421_v12 = vld [vmem:[#allocation11 + $0x78] sm:$0xff]  ;;  %s555_s21 = sshll.u32 %s849_s20, 4  ;;  %s556_s21 = int_to_ptr.vmem [resolvable:$true] %s555_s21 }
  0x4d   :  { %611 = vmatprep.subr.mxu1 %v844_v0  ;;  %600 = vmatprep.subr.mxu0 %v844_v0  ;;  %v110_v10 = vld [vmem:[#allocation5] sm:$0xff]  ;;  %v262_v14 = vld [vmem:[#allocation7] sm:$0xff]  ;;  %v420_v15 = vld [vmem:[#allocation11 + $0x70] sm:$0xff]  ;;  %p789_p3 = scmp.lt.s32.totalorder %s556_s21, %s556_s21 }
  0x4e   :  { %612 = vmatpush3.msra.mxu1 %v108_v3  ;;  %601 = vmatpush3.msra.mxu0 %v113_v4  ;;  %v263_v13 = vld [vmem:[#allocation11 + $0x40] sm:$0xff]  ;;  %v342_v16 = vld [vmem:[#allocation11 + $0x58] sm:$0xff]  ;;  %v419_v17 = vld [vmem:[#allocation11 + $0x68] sm:$0xff] }
  0x4f   :  { %613 = vmatprep.subr.mxu1 %v844_v0  ;;  %602 = vmatprep.subr.mxu0 %v844_v0  ;;  %v341_v18 = vld [vmem:[#allocation11 + $0x50] sm:$0xff]  ;;  %v418_v20 = vld [vmem:[#allocation11 + $0x60] sm:$0xff]  ;;  %v417_v21 = vld [vmem:[#allocation10] sm:$0xff] }
  0x50   :  { %614 = vmatpush3.msra.mxu1 %v107_v5  ;;  %603 = vmatpush3.msra.mxu0 %v112_v6  ;;  %v340_v19 = vld [vmem:[#allocation8] sm:$0xff]  ;;  %v576_v33 = vld [vmem:[%s971_s7] ss:$0 sm:$0xff]  ;;  %s848_s7 = smov 96  }
  0x51   :  { %615 = vmatprep.subr.mxu1 %v844_v0  ;;  %604 = vmatprep.subr.mxu0 %v844_v0  ;;  %v507_v39 = vld [vmem:[%s969_s5] sm:$0xff]  ;;  %s784_s5 = scalar_lea.vmem %s556_s21, 128 }
  0x52   :  { %616 = vmatpush3.msra.mxu1 %v106_v7  ;;  %605 = vmatpush3.msra.mxu0 %v111_v8  ;;  %p785_p2 = scmp.ne.s32.totalorder %s556_s21, %s784_s5  ;;  %p790_p4 = scmp.lt.s32.totalorder %s784_s5, %s784_s5 }
  0x53   :  { %618 = vmatmul.mubr.msk.f32.vlgmr.msra.gmra.mxu1 %vm115_vm1, %v105_v9  ;;  %620 = vmatprep.subr.mxu1 %v844_v0 }
  0x54   :  { %607 = vmatmul.mubr.msk.f32.vlgmr.msra.gmra.mxu0 %vm115_vm1, %v110_v10  ;;  %621 = vmatpush3.msra.mxu1 %v264_v11  ;;  %p791_p5 = por %p790_p4, %p789_p3 }
  0x55   :  { %634 = vmatprep.subr.mxu0 %v844_v0  ;;  %622 = vmatprep.subr.mxu1 %v844_v0 }
  0x56   :  { %635 = vmatpush3.msra.mxu0 %v421_v12  ;;  %623 = vmatpush3.msra.mxu1 %v263_v13  ;;  %p792_p6 = pnand %p791_p5, %p785_p2 }
  0x57   :  { %624 = vmatprep.mubr.msk.f32.mxu1 %vm845_vm0, %v844_v0  ;;  %636 = vmatprep.subr.mxu0 %v844_v0 }
  0x58   :  { %625 = vmatmul.mubr.msk.f32.vlgmr.msra.gmra.mxu1 %vm265_vm2, %v262_v14  ;;  %627 = vmatprep.subr.mxu1 %v844_v0 }
  0x59   :  { %637 = vmatpush3.msra.mxu0 %v420_v15  ;;  %628 = vmatpush3.msra.mxu1 %v342_v16 }
  0x5a   :  { %638 = vmatprep.subr.mxu0 %v844_v0  ;;  %629 = vmatprep.subr.mxu1 %v844_v0 }
  0x5b   :  { %639 = vmatpush3.msra.mxu0 %v419_v17  ;;  %630 = vmatpush3.msra.mxu1 %v341_v18 }
  0x5c   :  { %631 = vmatprep.mubr.msk.f32.mxu1 %vm845_vm0, %v844_v0  ;;  %640 = vmatprep.subr.mxu0 %v844_v0 }
  0x5d   :  { %632 = vmatmul.mubr.msk.f32.vlgmr.msra.gmra.mxu1 %vm265_vm2, %v340_v19  ;;  %641 = vmatpush3.msra.mxu0 %v418_v20 }
  0x5e   :  { %642 = vmatprep.mubr.msk.f32.mxu0 %vm845_vm0, %v844_v0 }
  0x5f   :  { %643 = vmatmul.mubr.msk.f32.vlgmr.msra.gmra.mxu0 %vm115_vm1, %v417_v21 }
 0x113   :  { %v258_v22 = vpop.f32.mrf.mxu1 }
 0x114   :  { %v185_v23 = vpop.f32.mrf.mxu0 }
 0x115   :  { %v619_v24 = vpop.f32.mrf.mxu1  ;;  %v259_v27 = vadd.f32 %v258_v22, %v185_v23 }
 0x116   :  { %v608_v25 = vpop.f32.mrf.mxu0 }
 0x118   :  { %v335_v26 = vpop.f32.mrf.mxu1 }
 0x119   :  { %v339_v29 = vadd.f32 %v335_v26, %v259_v27 }
 0x11a   :  { %v626_v28 = vpop.f32.mrf.mxu1 }
 0x11d   :  { %v412_v30 = vpop.f32.mrf.mxu1 }
 0x11e   :  { %v416_v31 = vadd.f32 %v412_v30, %v339_v29 }
 0x11f   :  { %v491_v32 = vpop.f32.mrf.mxu0  ;;  %v633_v34 = vpop.f32.mrf.mxu1 }
 0x120   :  { %v495_v35 = vadd.f32 %v491_v32, %v416_v31 }
 0x121   :  { %v644_v36 = vpop.f32.mrf.mxu0 }
 0x122   :  { %v503_v37 = vadd.f32 %v576_v33, %v495_v35 }
 0x124   :  { %660 = vtanh.f32 %v503_v37 }
 0x131   :  { %v661_v38 = vpop.eup %660 }
 0x132   :  { %514 = vrot.lane.b32.xlu0 %v661_v38, %s846_s16  ;;  %v505_v40 = vmul.f32 0.5, %v661_v38 }
 0x134   :  { %v506_v41 = vadd.f32 0.5, %v505_v40 }
 0x136   :  { %509 = vrot.lane.b32.xlu0 %v507_v39, %s847_s19 }
 0x1a4   :  { %v515_v42 = vpop.permute.xlu0 %514 }
 0x1a5   :  { %v517_v43 = vmul.f32 %v515_v42, %v506_v41 }
 0x1a7   :  { %519 = vrot.lane.b32.xlu1 %v517_v43, %s847_s19 }
 0x1a8   :  { %v510_v44 = vpop.permute.xlu0 %509 }
 0x1a9   :  { %v512_v45 = vmul.f32 %v510_v44, %v506_v41 }
 0x219   :  { %v520_v46 = vpop.permute.xlu1 %519 }
 0x21a   :  { %v522_v47 = vadd.f32 %v520_v46, %v512_v45 }
 0x21c   :  { %662 = vtanh.f32 %v522_v47 }
 0x229   :  { %v663_v48 = vpop.eup %662 }
 0x22a   :  { %525 = vrot.lane.b32.xlu1 %v663_v48, %s846_s16 }
 0x22e   :  { %535 = vrot.lane.b32.xlu1 %v522_v47, %s848_s7 }
 0x29c   :  { %v526_v49 = vpop.permute.xlu1 %525 }
 0x29d   :  { %v528_v50 = vmul.f32 %v526_v49, %v506_v41 }
 0x29f   :  { %530 = vrot.lane.b32.xlu0 %v528_v50, %s847_s19 }
 0x2a0   :  { %v536_v51 = vpop.permute.xlu1 %535 }
 0x2a1   :  { %538 = vst.msk [vmem:[#allocation14] sm:$0xff] %vm115_vm1, %v536_v51 }
 0x2a2   :  { %795 = shalt.err (!%p792_p6)
}
 0x2a3   :  { %558 = dma.vmem_to_hbm [thread:$0]  %s556_s21, 128, %s973_s9, [#allocation15]  }
 0x2a4   :  { %s850_s1 = smov [#allocation13]  }
 0x2a5   :  { %s545_s24 = sshll.u32 %s850_s1, 4  ;;  %s546_s24 = int_to_ptr.vmem [resolvable:$true] %s545_s24 }
 0x2a6   :  { %s804_s25 = scalar_lea.vmem %s546_s24, 128  ;;  %p809_p8 = scmp.lt.s32.totalorder %s546_s24, %s546_s24 }
 0x2a7   :  { %p805_p7 = scmp.ne.s32.totalorder %s546_s24, %s804_s25  ;;  %p810_p9 = scmp.lt.s32.totalorder %s804_s25, %s804_s25 }
 0x2a9   :  { %p811_p10 = por %p810_p9, %p809_p8 }
 0x2ab   :  { %p812_p11 = pnand %p811_p10, %p805_p7 }
 0x311   :  { %v531_v52 = vpop.permute.xlu0 %530 }
 0x312   :  { %533 = vst.msk [vmem:[#allocation13] sm:$0xff] %vm115_vm1, %v531_v52 }
 0x313   :  { %815 = shalt.err (!%p812_p11)
}
 0x314   :  { %548 = dma.vmem_to_hbm [thread:$0]  %s546_s24, 128, %s972_s8, [#allocation4]  }
 0x315   :  { %832 = dma.done.wait [#allocation4], 128  }
 0x316   :  { %833 = vsyncadd [#allocation4], 4294967168 }
 0x317   :  { %834 = dma.done.wait [#allocation15], 128  }
 0x318   :  { %835 = vsyncadd [#allocation15], 4294967168 }
 0x319   :  { %565 = vsyncpa [#allocation3], 1 }
 0x31a   :  { %566 = vsyncpa [#allocation6], 1 }
 0x31b   :  { %567 = vsyncpa [#allocation9], 1 }
 0x31c   :  { %568 = vsyncpa [#allocation12], 1 }
 0x31d   :  { %569 = vsyncpa [#allocation4], 1 }
 0x31e   :  { %570 = vsyncpa [#allocation15], 1 }

</bundles_post_ra>
